<compile_context>
chip_gen: v7x
topology: tpu7x:2x2x1
jax: 0.10.0
libtpu: 0.0.40
codegen_flags: <defaults>
</compile_context>

<pallas_src>
import jax
import jax.numpy as jnp
from jax.experimental import pallas as pl
from jax.experimental.pallas import tpu as pltpu


def prior_disc_kernel(x_ref, w01_ref, b01_ref, w2_ref, b2_ref, o_ref):
    x = x_ref[...]                                              # [bb, D] (bf16 or f32)
    mm_dtype = w01_ref.dtype

    # layer 0: Linear(D,D) + ReLU  (MXU matmul, f32 accumulation; bias/ReLU on VPU in f32)
    h = jnp.dot(x, w01_ref[0], preferred_element_type=jnp.float32) + b01_ref[0]
    h = jnp.maximum(h, 0.0)

    # layer 1: Linear(D,D) + ReLU
    h = jnp.dot(h.astype(mm_dtype), w01_ref[1],
                preferred_element_type=jnp.float32) + b01_ref[1]
    h = jnp.maximum(h, 0.0)

    # layer 2: Linear(D,1) + Sigmoid.  Contract w2 [1,D] with h [bb,D] over their last dims
    # -> a lane-dense [1, bb] row (unmasked store) instead of a masked [bb, 1] column.
    z = jax.lax.dot_general(
        w2_ref[...], h.astype(mm_dtype),
        dimension_numbers=(((1,), (1,)), ((), ())),
        preferred_element_type=jnp.float32)                     # [1, bb]
    z = z + b2_ref[0]
    o_ref[0] = jax.nn.sigmoid(z).astype(o_ref.dtype)            # o block is [1, 1, bb]


def _round_up(v, m):
    return -(-v // m) * m


def prior_discriminator(x, params, *, block_b=512, matmul_dtype=jnp.bfloat16):
    """x: [B, D].

    params: {"w01": [2,D,D], "b01": [2,1,D], "w2": [1,D], "b2": [1]}  (W stored [in,out]).
    matmul_dtype: dtype fed to the MXU (default bf16; accumulation is always f32).
    """
    B, D = x.shape
    if matmul_dtype is None:
        matmul_dtype = x.dtype
    matmul_dtype = jnp.dtype(matmul_dtype)

    # MXU operands in matmul_dtype; bias / elementwise path stays f32.
    x_mm = x if x.dtype == matmul_dtype else x.astype(matmul_dtype)
    w01 = params["w01"].astype(matmul_dtype)
    w2 = params["w2"].astype(matmul_dtype)
    b01 = params["b01"].astype(jnp.float32)
    b2 = params["b2"].astype(jnp.float32)

    # Batch tile: sublane multiple for the matmul dtype (8 f32 / 16 bf16), large enough to
    # approach the HBM roofline, small enough that the grid has >=2 tiles when B allows
    # (v7x: 2 TensorCores split the "parallel" axis).  Ragged B -> partial last block.
    min_rows = 8 * (4 // matmul_dtype.itemsize)
    if B <= 2 * min_rows:
        bb = B                                   # single block == full array (layout-exempt)
    else:
        bb = max(min_rows, min(block_b, _round_up(pl.cdiv(B, 2), min_rows)))
    n_tiles = pl.cdiv(B, bb)
    grid = (n_tiles,)

    # Explicit VMEM budget (v7x: 64 MiB physical / 32 MiB scoped default).
    mm_b = matmul_dtype.itemsize
    vmem_est = (2 * bb * D * mm_b            # double-buffered x tiles
                + 2 * 2 * D * D * mm_b       # packed w01 (double-buffered; see TODO above)
                + 2 * 2 * D * 4              # packed b01
                + 2 * D * mm_b               # w2
                + 2 * bb * 4                 # output tiles
                + 4 * bb * D * 4)            # f32 intermediates / headroom
    vmem_limit = int(min(max(32 * 2**20, 2 * vmem_est), 60 * 2**20))

    out = pl.pallas_call(
        prior_disc_kernel,
        out_shape=jax.ShapeDtypeStruct((n_tiles, 1, bb), jnp.float32),
        grid=grid,
        in_specs=[
            pl.BlockSpec((bb, D), lambda i: (i, 0)),            # x, streamed over batch tiles
            pl.BlockSpec((2, D, D), lambda i: (0, 0, 0)),       # packed W0/W1 (grid-invariant)
            pl.BlockSpec((2, 1, D), lambda i: (0, 0, 0)),       # packed b0/b1
            pl.BlockSpec((1, D), lambda i: (0, 0)),             # w2 as a lane row
            pl.BlockSpec(memory_space=pltpu.MemorySpace.SMEM),  # b2 scalar in SMEM
        ],
        out_specs=pl.BlockSpec((1, 1, bb), lambda i: (i, 0, 0)),  # lane-dense [1,bb] rows
        compiler_params=pltpu.CompilerParams(
            dimension_semantics=("parallel",),   # v7x: batch tiles split across the 2 TCs
            vmem_limit_bytes=vmem_limit,
        ),
    )(x_mm, w01, b01, w2, b2)

    # [n_tiles, 1, bb] row-slabs -> [B, 1]; padded tail rows of the last tile are dropped.
    return out.reshape(n_tiles * bb, 1)[:B]


def init_params(key, input_dim):
    """Deterministic init mimicking PyTorch nn.Linear default U(-1/sqrt(in), 1/sqrt(in)),
    stored in the packed layout the kernel consumes."""
    ks = jax.random.split(key, 6)

    def linear(kw, kb, fan_in, fan_out):
        bound = 1.0 / jnp.sqrt(jnp.float32(fan_in))
        w_t = jax.random.uniform(kw, (fan_in, fan_out), jnp.float32, -bound, bound)
        b = jax.random.uniform(kb, (1, fan_out), jnp.float32, -bound, bound)
        return w_t, b

    w0, b0 = linear(ks[0], ks[1], input_dim, input_dim)
    w1, b1 = linear(ks[2], ks[3], input_dim, input_dim)
    w2, b2 = linear(ks[4], ks[5], input_dim, 1)

    return {
        "w01": jnp.stack([w0, w1]),            # [2, D, D]
        "b01": jnp.stack([b0, b1]),            # [2, 1, D]
        "w2": w2.T,                            # [1, D]
        "b2": b2.reshape((1,)),                # [1]  (SMEM scalar)
    }


def reference_forward(x, p):
    h = jax.nn.relu(x @ p["w01"][0] + p["b01"][0])
    h = jax.nn.relu(h @ p["w01"][1] + p["b01"][1])
    return jax.nn.sigmoid(h @ p["w2"].T + p["b2"])


if __name__ == "__main__":
    key = jax.random.PRNGKey(0)
    k_param, k_x = jax.random.split(key)

    # Lane-aligned hidden dim (full 128-lane vregs); B chosen so the grid has 2 tiles and a
    # ragged (partial) last block, exercising the no-pad path.
    B, D = 40, 128
    params = init_params(k_param, D)
    x = jax.random.normal(k_x, (B, D), jnp.float32)

    ref = reference_forward(x, params)

    # Default bf16 MXU path (f32 accumulation) -- loosened tolerance.
    out_bf16 = jax.block_until_ready(prior_discriminator(x, params))
    assert out_bf16.shape == (B, 1)
    assert jnp.allclose(out_bf16, ref, atol=3e-2), float(jnp.max(jnp.abs(out_bf16 - ref)))

    # f32 MXU path -- tight tolerance against the reference.
    out_f32 = jax.block_until_ready(
        prior_discriminator(x, params, matmul_dtype=jnp.float32))
    assert out_f32.shape == (B, 1)
    assert jnp.allclose(out_f32, ref, atol=1e-5, rtol=1e-5)

    print("KERNEL_OK")
</pallas_src>

<mosaic_0001>
module attributes {stable_mosaic.version = 11 : i64} {
  func.func @prior_disc_kernel(%arg0: i32, %arg1: memref<32x128xbf16, #tpu.memory_space<vmem>>, %arg2: memref<2x128x128xbf16, #tpu.memory_space<vmem>>, %arg3: memref<2x1x128xf32, #tpu.memory_space<vmem>>, %arg4: memref<1x128xbf16, #tpu.memory_space<vmem>>, %arg5: memref<1xf32, #tpu.memory_space<smem>>, %arg6: memref<1x1x32xf32, #tpu.memory_space<vmem>>) attributes {dimension_semantics = [#tpu.dimension_semantics<parallel>], iteration_bounds = array<i64: 2>, scalar_prefetch = 0 : i64, scratch_operands = 0 : i64, tpu.core_type = #tpu.core_type<tc>, window_params = [{transform_indices = @transform_0, window_bounds = array<i64: 32, 128>}, {pipeline_mode = #tpu.pipeline_mode<synchronous>, transform_indices = @transform_1, window_bounds = array<i64: 2, 128, 128>}, {pipeline_mode = #tpu.pipeline_mode<synchronous>, transform_indices = @transform_2, window_bounds = array<i64: 2, 1, 128>}, {pipeline_mode = #tpu.pipeline_mode<synchronous>, transform_indices = @transform_3, window_bounds = array<i64: 1, 128>}, {transform_indices = @transform_4, window_bounds = array<i64: 1>}, {transform_indices = @transform_5, window_bounds = array<i64: 1, 1, 32>}]} {
    %c0 = arith.constant 0 : index
    %c0_0 = arith.constant 0 : index
    %0 = vector.load %arg1[%c0, %c0_0] : memref<32x128xbf16, #tpu.memory_space<vmem>>, vector<32x128xbf16>
    %c0_1 = arith.constant 0 : index
    %c0_2 = arith.constant 0 : index
    %c0_3 = arith.constant 0 : index
    %1 = vector.load %arg2[%c0_1, %c0_2, %c0_3] : memref<2x128x128xbf16, #tpu.memory_space<vmem>>, vector<1x128x128xbf16>
    %2 = vector.shape_cast %1 : vector<1x128x128xbf16> to vector<128x128xbf16>
    %cst = arith.constant dense<0.000000e+00> : vector<32x128xf32>
    %3 = tpu.matmul %0, %2, %cst {dimension_numbers = #tpu.dot_dimension_numbers<[1], [0], [0], [1], [0, 0, 1, 1], [], []>} : vector<32x128xbf16>, vector<128x128xbf16>, vector<32x128xf32> -> vector<32x128xf32>
    %c0_4 = arith.constant 0 : index
    %c0_5 = arith.constant 0 : index
    %c0_6 = arith.constant 0 : index
    %4 = vector.load %arg3[%c0_4, %c0_5, %c0_6] : memref<2x1x128xf32, #tpu.memory_space<vmem>>, vector<1x1x128xf32>
    %5 = vector.shape_cast %4 : vector<1x1x128xf32> to vector<1x128xf32>
    %6 = vector.broadcast %5 : vector<1x128xf32> to vector<32x128xf32>
    %7 = arith.addf %3, %6 : vector<32x128xf32>
    %cst_7 = arith.constant 0.000000e+00 : f32
    %8 = vector.broadcast %cst_7 : f32 to vector<32x128xf32>
    %9 = arith.maximumf %7, %8 : vector<32x128xf32>
    %10 = arith.truncf %9 : vector<32x128xf32> to vector<32x128xbf16>
    %c1 = arith.constant 1 : index
    %c0_8 = arith.constant 0 : index
    %c0_9 = arith.constant 0 : index
    %11 = vector.load %arg2[%c1, %c0_8, %c0_9] : memref<2x128x128xbf16, #tpu.memory_space<vmem>>, vector<1x128x128xbf16>
    %12 = vector.shape_cast %11 : vector<1x128x128xbf16> to vector<128x128xbf16>
    %cst_10 = arith.constant dense<0.000000e+00> : vector<32x128xf32>
    %13 = tpu.matmul %10, %12, %cst_10 {dimension_numbers = #tpu.dot_dimension_numbers<[1], [0], [0], [1], [0, 0, 1, 1], [], []>} : vector<32x128xbf16>, vector<128x128xbf16>, vector<32x128xf32> -> vector<32x128xf32>
    %c1_11 = arith.constant 1 : index
    %c0_12 = arith.constant 0 : index
    %c0_13 = arith.constant 0 : index
    %14 = vector.load %arg3[%c1_11, %c0_12, %c0_13] : memref<2x1x128xf32, #tpu.memory_space<vmem>>, vector<1x1x128xf32>
    %15 = vector.shape_cast %14 : vector<1x1x128xf32> to vector<1x128xf32>
    %16 = vector.broadcast %15 : vector<1x128xf32> to vector<32x128xf32>
    %17 = arith.addf %13, %16 : vector<32x128xf32>
    %cst_14 = arith.constant 0.000000e+00 : f32
    %18 = vector.broadcast %cst_14 : f32 to vector<32x128xf32>
    %19 = arith.maximumf %17, %18 : vector<32x128xf32>
    %c0_15 = arith.constant 0 : index
    %c0_16 = arith.constant 0 : index
    %20 = vector.load %arg4[%c0_15, %c0_16] : memref<1x128xbf16, #tpu.memory_space<vmem>>, vector<1x128xbf16>
    %21 = arith.truncf %19 : vector<32x128xf32> to vector<32x128xbf16>
    %cst_17 = arith.constant dense<0.000000e+00> : vector<1x32xf32>
    %22 = tpu.matmul %20, %21, %cst_17 {dimension_numbers = #tpu.dot_dimension_numbers<[1], [1], [0], [0], [0, 0, 1, 0], [], []>} : vector<1x128xbf16>, vector<32x128xbf16>, vector<1x32xf32> -> vector<1x32xf32>
    %c0_18 = arith.constant 0 : index
    %23 = memref.load %arg5[%c0_18] : memref<1xf32, #tpu.memory_space<smem>>
    %24 = vector.broadcast %23 : f32 to vector<1x32xf32>
    %25 = arith.addf %22, %24 : vector<1x32xf32>
    %26 = arith.negf %25 : vector<1x32xf32>
    %27 = math.exp %26 : vector<1x32xf32>
    %cst_19 = arith.constant 1.000000e+00 : f32
    %28 = vector.broadcast %cst_19 : f32 to vector<1x32xf32>
    %29 = arith.addf %28, %27 : vector<1x32xf32>
    %30 = arith.divf %28, %29 : vector<1x32xf32>
    %c0_20 = arith.constant 0 : index
    %c0_21 = arith.constant 0 : index
    %c0_22 = arith.constant 0 : index
    %31 = vector.load %arg6[%c0_20, %c0_21, %c0_22] : memref<1x1x32xf32, #tpu.memory_space<vmem>>, vector<1x1x32xf32>
    %32 = vector.shape_cast %31 : vector<1x1x32xf32> to vector<1x32xf32>
    %33 = vector.shape_cast %30 : vector<1x32xf32> to vector<1x1x32xf32>
    tpu.vector_store %arg6[%c0_20, %c0_21, %c0_22], %33 {strides = array<i32>} : memref<1x1x32xf32, #tpu.memory_space<vmem>>, vector<1x1x32xf32>,
    return
  }
  func.func @transform_0(%arg0: i32) -> (i32, i32) {
    %c0_i32 = arith.constant 0 : i32
    %c0_i32_0 = arith.constant 0 : i32
    return %arg0, %c0_i32 : i32, i32
  }
  func.func @transform_1(%arg0: i32) -> (i32, i32, i32) {
    %c0_i32 = arith.constant 0 : i32
    %c0_i32_0 = arith.constant 0 : i32
    %c0_i32_1 = arith.constant 0 : i32
    %c0_i32_2 = arith.constant 0 : i32
    return %c0_i32, %c0_i32_0, %c0_i32_1 : i32, i32, i32
  }
  func.func @transform_2(%arg0: i32) -> (i32, i32, i32) {
    %c0_i32 = arith.constant 0 : i32
    %c0_i32_0 = arith.constant 0 : i32
    %c0_i32_1 = arith.constant 0 : i32
    %c0_i32_2 = arith.constant 0 : i32
    return %c0_i32, %c0_i32_0, %c0_i32_1 : i32, i32, i32
  }
  func.func @transform_3(%arg0: i32) -> (i32, i32) {
    %c0_i32 = arith.constant 0 : i32
    %c0_i32_0 = arith.constant 0 : i32
    %c0_i32_1 = arith.constant 0 : i32
    return %c0_i32, %c0_i32_0 : i32, i32
  }
  func.func @transform_4(%arg0: i32) -> i32 {
    %c0_i32 = arith.constant 0 : i32
    %c0_i32_0 = arith.constant 0 : i32
    return %c0_i32 : i32
  }
  func.func @transform_5(%arg0: i32) -> (i32, i32, i32) {
    %c0_i32 = arith.constant 0 : i32
    %c0_i32_0 = arith.constant 0 : i32
    %c0_i32_1 = arith.constant 0 : i32
    return %arg0, %c0_i32, %c0_i32_0 : i32, i32, i32
  }
}

</mosaic_0001>

<bundles_post_ra>
// kernel: tpu_custom_call.1
= control target key start
LH: loop header
LB: loop body
LE: loop exit
PB: predicated region body
PF: predicated region fallthrough
CT: control target
= control target key end

     0   :  { %s1252_s0 = inlined_call_operand.hbm [shape: bf16[40,128], index: 0, kind: input, shape index: {}]   ;;  %s1253_s1 = inlined_call_operand.hbm [shape: bf16[2,128,128], index: 1, kind: input, shape index: {}]   ;;  %s1254_s2 = inlined_call_operand.vmem [shape: f32[2,1,128], index: 2, kind: input, shape index: {}]   ;;  %s1255_s3 = inlined_call_operand.vmem [shape: bf16[1,128], index: 3, kind: input, shape index: {}]   ;;  %s1256_s4 = inlined_call_operand.<no memory space> [shape: f32[1], index: 4, kind: input, shape index: {}]   ;;  %s1257_s5 = inlined_call_operand.hbm [shape: f32[2,1,32], index: 5, kind: output, shape index: {}]  }
   0x1   :  { %10 = sst [smem:[#allocation2]] %s1256_s4 }
   0x2   :  { %11 = vsyncpa [#allocation4], 0 }
   0x3   :  { %13 = vsyncpa [#allocation4 + $0x1], 0 }
   0x4   :  { %14 = vsyncpa [#allocation7], 0 }
   0x5   :  { %15 = vsyncpa [#allocation5], 0 }
   0x6   :  { %17 = vsyncpa [#allocation5 + $0x1], 0  ;;  %s1040_s20 = smov 0   ;;  %s1042_s21 = smov 0  }
   0x7   :  { %s1044_s22 = smov 0   ;;  %s1046_s23 = smov 0  }
   0x8 LB: > { %s1061_s4 = sadd.s32 4294967295, %s996_s23   ;;  %s680_s24 = sadd.s32 4294967294, %s996_s23   ;;  %s996_s23 = sphi %s1046_s23, %s1278_s23   ;;  %s992_s22 = sphi %s1044_s22, %s1277_s22   ;;  %s988_s21 = sphi %s1042_s21, %s1276_s21   ;;  %s984_s20 = sphi %s1040_s20, %s1275_s20  }
   0x9   : > { %s1065_s25 = sadd.s32 1, %s996_s23   ;;  %s30_s26 = sadd.s32 1, %s992_s22 }
   0xa   : > { %s27_s27 = ssub.s32 %s996_s23, %s1065_s25  ;;  %p37_p0 = scmp.ne.s32.totalorder %s992_s22, %s988_s21 }
   0xb   : > { %p28_p1 = scmp.eq.s32.totalorder %s27_s27, 0  ;;  %p38_p2 = scmp.eq.s32.totalorder %s996_s23, 0 }
   0xc   : > { %p43_p3 = scmp.ne.s32.totalorder %s988_s21, %s984_s20  ;;  %p1258_p4 = scmp.eq.s32.totalorder %s1061_s4, 0 }
   0xd   : > { %s1077_s28 = scalar_select %p28_p1, %s992_s22, %s30_s26  }
   0xe   : > { %p1079_p5 = por %p38_p2, %p37_p0  ;;  %p1085_p6 = por %p1258_p4, %p43_p3 }
   0xf   : > { %p151_p7 = scmp.eq.s32.totalorder %s1061_s4, 1  ;;  %p157_p8 = scmp.eq.s32.totalorder %s680_s24, 1 }
  0x10   : > { %s1262_s29 = scalar_select %p1079_p5, 1, 0 }
  0x11   : > { %s1263_s30 = scalar_select %p1085_p6, 1, 0 }
  0x12   : > { %p681_p9 = scmp.ge.s32.totalorder %s996_s23, 1  ;;  %p164_p10 = scmp.lt.s32.totalorder %s996_s23, 3 }
  0x13   : > { %p1092_p11 = por %p151_p7, %p37_p0  ;;  %p1096_p12 = por %p157_p8, %p43_p3 }
  0x14   : > { %p1100_p13 = pnand %p681_p9, %p164_p10  ;;  %s998_s9 = smov [#allocation6]  }
  0x15   : > { %s1264_s6 = scalar_select %p1092_p11, 1, 0 }
  0x16   : > { %s1265_s7 = scalar_select %p1096_p12, 1, 0 }
  0x17   : > { %s1266_s8 = scalar_select %p1100_p13, 1, 0 }
  0x18   : > { %p798_p1 = pneg %p1100_p13  ;;  %s176_s10 = sshll.u32 %s998_s9, 4  ;;  %s177_s10 = int_to_ptr.vmem [resolvable:$true] %s176_s10 }
  0x19   : > { %s870_s14 = scalar_lea.hbm %s1253_s1, 2048 }
  0x1a   : > { %p1108_p2 = pnand %p798_p1, %p1258_p4  ;;  %p871_p0 = scmp.ne.s32.totalorder %s1253_s1, %s870_s14 }
  0x1b   : > { %p877_p9 = scmp.lt.u32.totalorder %s870_s14, %s1253_s1 }
  0x1c   : > { %p872_p3 = pneg %p1108_p2 }
  0x1e   : > { %p873_p7 = pnand %p872_p3, %p871_p0 }
  0x20   : > { %p874_p8 = pneg %p873_p7 }
  0x22   : > { %p879_p10 = pnand %p877_p9, %p874_p8 }
  0x24   : > { %882 = shalt.err (!%p879_p10)
}
  0x25   : > { %s883_s19 = scalar_lea.vmem %s177_s10, 2048  ;;  %p891_p11 = scmp.lt.s32.totalorder %s177_s10, %s177_s10 }
  0x26   : > { %p884_p1 = scmp.ne.s32.totalorder %s177_s10, %s883_s19  ;;  %p892_p6 = scmp.lt.s32.totalorder %s883_s19, %s883_s19 }
  0x28   : > { %p886_p4 = pnand %p884_p1, %p872_p3  ;;  %p893_p13 = por %p892_p6, %p891_p11 }
  0x2a   : > { %p887_p12 = pneg %p886_p4 }
  0x2c   : > { %p894_p5 = pnand %p893_p13, %p887_p12 }
  0x2e   : > { %897 = shalt.err (!%p894_p5)
}
  0x2f   : > { %s999_s24 = smov 64   ;;  %s1000_s26 = smov 4  }
  0x30   : > { %801 = dma.hbm_to_vmem [thread:$0]  (!%p1108_p2), %s1253_s1, 2048, %s177_s10, [#allocation7], %s999_s24, %s999_s24, %s1000_s26  }
  0x31   : > { %p683_p0 = scmp.ge.s32.totalorder %s996_s23, 2 }
  0x32   : > { %p1268_p4 = scmp.ne.s32.totalorder (!%p683_p0), %s1262_s29, 0 }
  0x33   : > { %195 = sbr.rel (%p683_p0) target bundleno = 93 (0x5d), region = 32 }
  0x3a   : > { %198 = sbr.rel (!%p1268_p4) target bundleno = 93 (0x5d), region = 36  ;;  %s199_s12 = sand.u32 (%p1268_p4), 1, %s992_s22  }
  0x3b   : > { %s685_s13 = sshll.u32 (%p1268_p4), %s996_s23, 2  ;;  %s684_s14 = sshll.u32 (%p1268_p4), %s199_s12, 4 }
  0x3c   : > { %s205_s15 = ssub.s32 (%p1268_p4), 5, %s685_s13  ;;  %s1138_s16 = scalar_lea.sflag (%p1268_p4), [#allocation4], %s199_s12 }
  0x3d   : > { %p206_p5 = scmp.lt.s32.totalorder (%p1268_p4), %s205_s15, 4  ;;  %s203_s17 = scalar_lea.vmem (%p1268_p4), [#allocation3], %s684_s14 }
  0x41   : > { %s1280_s15 = smov (!%p206_p5, %s205_s15), 4 }
  0x42   : > { %s1135_s11 = sshll.u32 %s1280_s15, 6 }
  0x43   : > { %s210_s10 = ssub.s32 256, %s1135_s11 }
  0x44   : > { %211 = vsyncadd %s1138_s16, %s210_s10  ;;  %p687_p6 = scmp.ne.s32.totalorder %s1135_s11, 0  ;;  %s719_s29 = sshll.u32 %s996_s23, 8 }
  0x45   : > { %s1146_s24 = scalar_lea.hbm %s1252_s0, %s719_s29  ;;  %s216_s26 = sshll.u32 %s203_s17, 4  ;;  %s1148_s26 = int_to_ptr.vmem [resolvable:$true] %s216_s26 }
  0x46   : > { %s898_s27 = scalar_lea.hbm %s1146_s24, %s1135_s11  ;;  %s902_s13 = scalar_lea.hbm %s1252_s0, 320 }
  0x47   : > { %p899_p11 = scmp.ne.s32.totalorder %s1146_s24, %s898_s27  ;;  %p903_p2 = scmp.lt.u32.totalorder %s1146_s24, %s1252_s0 }
  0x48   : > { %p904_p3 = scmp.lt.u32.totalorder %s902_s13, %s898_s27  ;;  %p906_p8 = scmp.lt.u32.totalorder %s898_s27, %s1146_s24 }
  0x49   : > { %p900_p12 = pnand %p899_p11, %p687_p6 }
  0x4a   : > { %p905_p7 = por %p904_p3, %p903_p2 }
  0x4b   : > { %p901_p13 = pneg %p900_p12 }
  0x4c   : > { %p907_p9 = por %p906_p8, %p905_p7 }
  0x4e   : > { %p908_p10 = pnand %p907_p9, %p901_p13 }
  0x50   : > { %911 = shalt.err (!%p908_p10)
}
  0x51   : > { %s912_s10 = scalar_lea.vmem %s1148_s26, %s1135_s11  ;;  %s1001_s17 = smov [#allocation3]  }
  0x52   : > { %p913_p1 = scmp.ne.s32.totalorder %s1148_s26, %s912_s10  ;;  %s916_s29 = sshll.u32 %s1001_s17, 4  ;;  %s917_s29 = int_to_ptr.vmem [resolvable:$false] %s916_s29 }
  0x53   : > { %s918_s18 = scalar_lea.vmem %s917_s29, 512  ;;  %p919_p11 = scmp.lt.s32.totalorder %s1148_s26, %s917_s29 }
  0x54   : > { %p914_p4 = pnand %p913_p1, %p687_p6  ;;  %p920_p12 = scmp.lt.s32.totalorder %s918_s18, %s912_s10 }
  0x56   : > { %p915_p5 = pneg %p914_p4  ;;  %p921_p2 = por %p920_p12, %p919_p11 }
  0x58   : > { %p922_p3 = pnand %p921_p2, %p915_p5 }
  0x5a   : > { %925 = shalt.err (!%p922_p3)
}
  0x5b   : > { %s1002_s19 = smov 64   ;;  %s1003_s27 = smov 4  }
  0x5c   : > { %222 = dma.hbm_to_vmem [thread:$0]  (%p687_p6), %s1146_s24, %s1135_s11, %s1148_s26, %s1138_s16, %s1002_s19, %s1002_s19, %s1003_s27  }
  0x5d PF: > { %p1269_p13 = scmp.ne.s32.totalorder %s1266_s8, 0 }
  0x5e   : > { %s1178_s9 = sand.u32 (!%p1269_p13), 1, %s988_s21   ;;  %p1270_p7 = scmp.ne.s32.totalorder (!%p1269_p13), %s1263_s30, 0 }
  0x5f   : > { %228 = sbr.rel (%p1269_p13) target bundleno = 851 (0x353), region = 40  ;;  %s692_s12 = sshll.u32 (!%p1269_p13), %s1178_s9, 4 }
  0x60   : > { %s231_s13 = scalar_lea.sflag (!%p1269_p13), [#allocation4], %s1178_s9  ;;  %s1182_s14 = scalar_lea.vmem (!%p1269_p13), [#allocation3], %s692_s12 }
  0x66   : > { %971 = dma.done.wait (%p1270_p7), %s231_s13, 256  }
  0x67   : > { %973 = vsyncadd (%p1270_p7), %s231_s13, 4294967040  ;;  %p1271_p6 = scmp.eq.s32.totalorder %s1061_s4, 0 }
  0x69   : > { %975 = dma.done.wait (%p1271_p6), [#allocation7], 2048   ;;  %p1272_p8 = pmov %p1271_p6 }
  0x6a   : > { %v848_v0 = vld [vmem:[#allocation6] sm:$0xff]   ;;  %v849_v1 = vld [vmem:[#allocation6 + $0x8] sm:$0xff]   ;;  %v850_v2 = vld [vmem:[#allocation6 + $0x10] sm:$0xff]   ;;  %v1004_v33 = vmov 0.0   ;;  %vm1005_vm0 = vmmov 0   ;;  %s541_s15 = sld [smem:[#allocation2]] }
  0x6b   : > { %977 = vsyncadd (%p1272_p8), [#allocation7], 4294965248  ;;  %743 = vmatprep.subr.bf16.mxu0 %v848_v0  ;;  %v851_v3 = vld [vmem:[#allocation6 + $0x18] sm:$0xff]   ;;  %v856_v4 = vld [vmem:[%s1182_s14] sm:$0xff]   ;;  %s716_s10 = sshll.u32 %s1061_s4, 4  ;;  %s263_s17 = scalar_lea.vmem [#allocation8], %s1178_s9 }
  0x6c   : > { %744 = vmatpush3.bf16.msra.mxu0 %v848_v0  ;;  %759 = vmatprep.mubr.bf16.mxu0 %v856_v4  ;;  %v858_v5 = vld [vmem:[#allocation6 + $0x40] sm:$0xff]   ;;  %v859_v6 = vld [vmem:[#allocation6 + $0x48] sm:$0xff]   ;;  %v860_v8 = vld [vmem:[#allocation6 + $0x50] sm:$0xff]   ;;  %s604_s29 = sshll.u32 %s263_s17, 4  ;;  %vm589_vm1 = vcmask 253952   ;;  %s1208_s27 = scalar_lea.hbm %s1257_s5, %s716_s10  ;;  %s1210_s29 = int_to_ptr.vmem [resolvable:$true] %s604_s29 }
  0x6d   : > { %745 = vmatprep.subr.bf16.mxu0 %v849_v1  ;;  %v852_v7 = vld [vmem:[#allocation6 + $0x20] sm:$0xff]   ;;  %763 = vmatprep.subr.bf16.mxu1 %v858_v5  ;;  %v853_v9 = vld [vmem:[#allocation6 + $0x28] sm:$0xff]   ;;  %v861_v10 = vld [vmem:[#allocation6 + $0x58] sm:$0xff]   ;;  %s592_s12 = scalar_lea.sflag [#allocation5], %s1178_s9  ;;  %s926_s13 = scalar_lea.vmem %s1210_s29, 16 }
  0x6e   : > { %764 = vmatpush3.bf16.msra.mxu1 %v858_v5  ;;  %v854_v11 = vld [vmem:[#allocation6 + $0x30] sm:$0xff]   ;;  %v862_v12 = vld [vmem:[#allocation6 + $0x60] sm:$0xff]   ;;  %v855_v13 = vld [vmem:[#allocation6 + $0x38] sm:$0xff]   ;;  %p927_p9 = scmp.ne.s32.totalorder %s1210_s29, %s926_s13  ;;  %p1273_p10 = scmp.ne.s32.totalorder %s1264_s6, 0 }
  0x6f   : > { %765 = vmatprep.subr.bf16.mxu1 %v859_v6  ;;  %v863_v14 = vld [vmem:[#allocation6 + $0x68] sm:$0xff]   ;;  %v864_v16 = vld [vmem:[#allocation6 + $0x70] sm:$0xff]   ;;  %v865_v17 = vld [vmem:[#allocation6 + $0x78] sm:$0xff]   ;;  %s1006_s4 = smov [#allocation8]  }
  0x70   : > { %746 = vmatpush3.bf16.msra.mxu0 %v849_v1  ;;  %v857_v15 = vld [vmem:[%s1182_s14 + $0x8] sm:$0xff]   ;;  %v694_v18 = vld [vmem:[%s1254_s2] ss:$0 sm:$0xff]  ;;  %v706_v34 = vld [vmem:[%s1254_s2 + $0x1] ss:$0 sm:$0xff]  ;;  %v542_v50 = vstv %s541_s15  ;;  %p928_p1 = pnand %p927_p9, %p1273_p10  ;;  %s930_s14 = sshll.u32 %s1006_s4, 4  ;;  %s931_s14 = int_to_ptr.vmem [resolvable:$false] %s930_s14 }
  0x71   : > { %747 = vmatprep.subr.bf16.mxu0 %v850_v2  ;;  %v538_v49 = vld [vmem:[%s1255_s3] sm:$0x1]  ;;  %s932_s30 = scalar_lea.vmem %s931_s14, 32  ;;  %p933_p5 = scmp.lt.s32.totalorder %s1210_s29, %s931_s14 }
  0x72   : > { %766 = vmatpush3.bf16.msra.mxu1 %v859_v6  ;;  %p929_p4 = pneg %p928_p1  ;;  %p934_p11 = scmp.lt.s32.totalorder %s932_s30, %s926_s13 }
  0x73   : > { %767 = vmatprep.subr.bf16.mxu1 %v860_v8 }
  0x74   : > { %748 = vmatpush3.bf16.msra.mxu0 %v850_v2  ;;  %p935_p12 = por %p934_p11, %p933_p5 }
  0x75   : > { %749 = vmatprep.subr.bf16.mxu0 %v851_v3 }
  0x76   : > { %768 = vmatpush3.bf16.msra.mxu1 %v860_v8  ;;  %p936_p2 = pnand %p935_p12, %p929_p4 }
  0x77   : > { %769 = vmatprep.subr.bf16.mxu1 %v861_v10 }
  0x78   : > { %750 = vmatpush3.bf16.msra.mxu0 %v851_v3 }
  0x79   : > { %751 = vmatprep.subr.bf16.mxu0 %v852_v7 }
  0x7a   : > { %770 = vmatpush3.bf16.msra.mxu1 %v861_v10 }
  0x7b   : > { %771 = vmatprep.subr.bf16.mxu1 %v862_v12 }
  0x7c   : > { %752 = vmatpush3.bf16.msra.mxu0 %v852_v7 }
  0x7d   : > { %753 = vmatprep.subr.bf16.mxu0 %v853_v9 }
  0x7e   : > { %772 = vmatpush3.bf16.msra.mxu1 %v862_v12 }
  0x7f   : > { %773 = vmatprep.subr.bf16.mxu1 %v863_v14 }
  0x80   : > { %754 = vmatpush3.bf16.msra.mxu0 %v853_v9 }
  0x81   : > { %755 = vmatprep.subr.bf16.mxu0 %v854_v11 }
  0x82   : > { %774 = vmatpush3.bf16.msra.mxu1 %v863_v14 }
  0x83   : > { %775 = vmatprep.subr.bf16.mxu1 %v864_v16 }
  0x84   : > { %756 = vmatpush3.bf16.msra.mxu0 %v854_v11 }
  0x85   : > { %757 = vmatprep.subr.bf16.mxu0 %v855_v13 }
  0x86   : > { %776 = vmatpush3.bf16.msra.mxu1 %v864_v16 }
  0x87   : > { %777 = vmatprep.subr.bf16.mxu1 %v865_v17 }
  0x88   : > { %758 = vmatpush3.bf16.msra.mxu0 %v855_v13 }
  0x89   : > { %783 = vmatprep.subr.bf16.mxu0 %v1004_v33 }
  0x8a   : > { %778 = vmatpush3.bf16.msra.mxu1 %v865_v17 }
  0x8b   : > { %760 = vmatmul.mubr.bf16.vlgmr.msra.gmra.mrb[0].mxu0 %v857_v15 }
  0x8c   : > { %787 = vmatprep.mubr.msk.bf16.mxu0 %vm1005_vm0, %v1004_v33 }
 0x15e   : > { %v761_v19 = vpop.f32.mrb[0].mxu0 }
 0x15f   : > { %v400_v20 = vadd.f32 %v761_v19, %v694_v18  ;;  %v391_v21 = vpop.f32.mrb[1].mxu0 }
 0x160   : > { %v392_v22 = vadd.f32 %v694_v18, %v391_v21  ;;  %v762_v23 = vpop.f32.mrb[2].mxu0 }
 0x161   : > { %v403_v24 = vadd.f32 %v762_v23, %v694_v18  ;;  %v394_v25 = vpop.f32.mrb[3].mxu0  ;;  %v408_v27 = vmax.f32 %v400_v20, 0.0 }
 0x162   : > { %v395_v26 = vadd.f32 %v694_v18, %v394_v25  ;;  %v406_v29 = vmax.f32 %v392_v22, 0.0 }
 0x163   : > { %v409_v28 = vmax.f32 %v403_v24, 0.0 }
 0x164   : > { %v407_v30 = vmax.f32 %v395_v26, 0.0 }
 0x165   : > { %v411_v31 = vpack.c.bf16 %v409_v28, %v408_v27 }
 0x166   : > { %v410_v32 = vpack.c.bf16 %v407_v30, %v406_v29 }
 0x168   : > { %779 = vmatprep.mubr.bf16.mxu1 %v410_v32 }
 0x169   : > { %780 = vmatmul.mubr.bf16.vlgmr.msra.gmra.mrb[0].mxu1 %v411_v31 }
 0x23c   : > { %v781_v35 = vpop.f32.mrb[0].mxu1 }
 0x23d   : > { %v528_v36 = vadd.f32 %v781_v35, %v706_v34  ;;  %v519_v37 = vpop.f32.mrb[1].mxu1 }
 0x23e   : > { %v520_v38 = vadd.f32 %v706_v34, %v519_v37  ;;  %v782_v39 = vpop.f32.mrb[2].mxu1 }
 0x23f   : > { %v531_v40 = vadd.f32 %v782_v39, %v706_v34  ;;  %v522_v41 = vpop.f32.mrb[3].mxu1  ;;  %v536_v43 = vmax.f32 %v528_v36, 0.0 }
 0x240   : > { %v523_v42 = vadd.f32 %v706_v34, %v522_v41  ;;  %v534_v45 = vmax.f32 %v520_v38, 0.0 }
 0x241   : > { %v537_v44 = vmax.f32 %v531_v40, 0.0 }
 0x242   : > { %v535_v46 = vmax.f32 %v523_v42, 0.0 }
 0x243   : > { %v540_v47 = vpack.c.bf16 %v537_v44, %v536_v43 }
 0x244   : > { %v539_v48 = vpack.c.bf16 %v535_v46, %v534_v45 }
 0x246   : > { %784 = vmatpush3.bf16.xpose.msra.mxu0 %v539_v48 }
 0x247   : > { %785 = vmatprep.subr.bf16.mxu0 %v1004_v33 }
 0x24e   : > { %786 = vmatpush3.bf16.xpose.msra.mxu0 %v540_v47 }
 0x255   : > { %788 = vmatmul.mubr.bf16.vlgmr.msra.gmra.mrb[4].mxu0 %v538_v49 }
 0x328   : > { %v577_v51 = vpop.f32.mrb[4].mxu0 }
 0x329   : > { %v578_v52 = vadd.f32 %v577_v51, %v542_v50  ;;  %v789_v53 = vpop.f32.mrb[5].mxu0 }
 0x32a   : > { %v580_v54 = vpop.f32.mrb[6].mxu0 }
 0x32b   : > { %v715_v55 = vmul.f32 -1.442695, %v578_v52  ;;  %v790_v56 = vpop.f32.mrb[7].mxu0 }
 0x32d   : > { %866 = vpow2.f32 %v715_v55 }
 0x337   : > { %v867_v57 = vpop.eup %866 }
 0x338   : > { %v586_v58 = vadd.f32 1.0, %v867_v57 }
 0x33a   : > { %868 = vrcp.f32 %v586_v58 }
 0x344   : > { %v869_v59 = vpop.eup %868 }
 0x345   : > { %590 = vst.msk [vmem:[%s263_s17] sm:$0x1] %vm589_vm1, %v869_v59 }
 0x346   : > { %939 = shalt.err (!%p936_p2)
}
 0x347   : > { %s940_s9 = scalar_lea.hbm %s1208_s27, 16  ;;  %s944_s16 = scalar_lea.hbm %s1257_s5, 32 }
 0x348   : > { %p941_p3 = scmp.ne.s32.totalorder %s1208_s27, %s940_s9  ;;  %p945_p6 = scmp.lt.u32.totalorder %s1208_s27, %s1257_s5 }
 0x349   : > { %p946_p8 = scmp.lt.u32.totalorder %s944_s16, %s940_s9  ;;  %p948_p1 = scmp.lt.u32.totalorder %s940_s9, %s1208_s27 }
 0x34a   : > { %p942_p13 = pnand %p941_p3, %p1273_p10 }
 0x34b   : > { %p947_p9 = por %p946_p8, %p945_p6 }
 0x34c   : > { %p943_p7 = pneg %p942_p13 }
 0x34d   : > { %p949_p4 = por %p948_p1, %p947_p9 }
 0x34f   : > { %p950_p5 = pnand %p949_p4, %p943_p7 }
 0x351   : > { %953 = shalt.err (!%p950_p5)
}
 0x352   : > { %796 = dma.vmem_to_hbm [thread:$0]  (%p1273_p10), %s1210_s29, 16, %s1208_s27, %s592_s12  }
 0x353 PF: > { %s616_s15 = sand.u32 1, %s984_s20   ;;  %p1274_p11 = scmp.ne.s32.totalorder %s1265_s7, 0 }
 0x354   : > { %s617_s10 = scalar_lea.sflag [#allocation5], %s616_s15 }
 0x355   : > { %p803_p12 = pnand %p683_p0, %p1274_p11 }
 0x357   : > { %979 = dma.done.wait (!%p803_p12), %s617_s10, 16  }
 0x358   : > { %981 = vsyncadd (!%p803_p12), %s617_s10, 4294967280  ;;  %p20_p2 = scmp.ge.s32.totalorder %s1065_s25, 4   ;;  %s1275_s20 = smov %s988_s21 }
 0x359   : > { %s1276_s21 = smov %s992_s22  ;;  %s1277_s22 = smov %s1077_s28 }
 0x35a   : > { %s1278_s23 = smov %s1065_s25  ;;  %22 = sbr.rel (!%p20_p2) target bundleno = 8 (0x8), region = 91 }
 0x361   :  { %621 = vsyncpa [#allocation4], 1 }
 0x362   :  { %623 = vsyncpa [#allocation4 + $0x1], 1 }
 0x363   :  { %624 = vsyncpa [#allocation7], 1 }
 0x364   :  { %625 = vsyncpa [#allocation5], 1 }
 0x365   :  { %627 = vsyncpa [#allocation5 + $0x1], 1 }

</bundles_post_ra>
